<compile_context>
chip_gen: v5e
topology: v5e:2x2
jax: 0.10.0
libtpu: 0.0.40
codegen_flags: <defaults>
</compile_context>

<pallas_src>
import jax
import jax.numpy as jnp
from jax.experimental import pallas as pl
from jax.experimental.pallas import tpu as pltpu


def _downsample_kernel(xa_ref, xb_ref, w_ref, b_ref, o_ref):
    # xa_ref: (1, tHo, 2, Wo+1, 2*C)  -- rows hq in [i*tHo, (i+1)*tHo) of the
    #                                    (hq, ph) padded-row grid (hp = 2*hq+ph)
    # xb_ref: (1, 1, 1, Wo+1, 2*C)    -- boundary even row hq = (i+1)*tHo
    # w_ref : (9, C, C)               -- index kh*3+kw, laid out (cin, cout)
    # b_ref : (1, C)
    # o_ref : (1, C, tHo*Wo)          -- NCHW-flat output block
    tho = xa_ref.shape[1]
    wo = xa_ref.shape[3] - 1
    c = xa_ref.shape[4] // 2
    tm = tho * wo

    xa = xa_ref[0]                                   # (tHo, 2, Wo+1, 2C)
    # Even padded rows hq = i*tHo .. (i+1)*tHo (inclusive) and odd rows.
    x_even = jnp.concatenate([xa[:, 0], xb_ref[0, :, 0]], axis=0)  # (tHo+1, Wo+1, 2C)
    x_odd = xa[:, 1]                                               # (tHo,   Wo+1, 2C)

    acc = jnp.zeros((tm, c), jnp.float32)
    for kh in range(3):
        if kh == 0:
            rows = x_even[:tho]       # padded row 2*ho
        elif kh == 1:
            rows = x_odd              # padded row 2*ho + 1
        else:
            rows = x_even[1:]         # padded row 2*ho + 2
        for kw in range(3):
            if kw == 0:
                tap = rows[:, :wo, :c]      # padded col 2*wo
            elif kw == 1:
                tap = rows[:, :wo, c:]      # padded col 2*wo + 1
            else:
                tap = rows[:, 1:, :c]       # padded col 2*wo + 2
            acc = acc + jnp.dot(tap.reshape(tm, c), w_ref[kh * 3 + kw],
                                preferred_element_type=jnp.float32)

    acc = acc + b_ref[...].astype(jnp.float32)       # fold bias once, in f32
    # Write NCHW-directly: (tm, C) -> (C, tm); lane dim of the store is tm.
    o_ref[0] = acc.T.astype(o_ref.dtype)


def _pick_row_tile(ho, wo, c, itemsize):
    """Largest divisor of Ho whose input block fits a VMEM budget and keeps the
    output block's last dim either the full Ho*Wo or a multiple of 128."""
    budget = 6 * 1024 * 1024  # per (double-buffered) main input block
    for t in range(ho, 0, -1):
        if ho % t:
            continue
        if not (t == ho or (t * wo) % 128 == 0):
            continue
        blk_bytes = t * 2 * (wo + 1) * 2 * c * itemsize
        if blk_bytes <= budget:
            return t
    return ho  # fallback: whole image (always correct)


def downsample_forward(x_nchw, t, weight_oihw, bias):
    """Conv2d(C, C, 3, stride=2, padding=1) on NCHW input. `t` is ignored."""
    del t  # unused by the PyTorch module's forward
    N, C, H, W = x_nchw.shape
    # The PyTorch module itself asserts out == H//2, W//2, which only holds for
    # even spatial dims -- keep the same contract explicitly.
    assert H % 2 == 0 and W % 2 == 0, "Downsample requires even H and W"
    Ho, Wo = H // 2, W // 2

    # NCHW -> NHWC + zero pad by 1 (single layout pass in XLA).
    x = jnp.transpose(x_nchw, (0, 2, 3, 1))
    xp = jnp.pad(x, ((0, 0), (1, 1), (1, 1), (0, 0)))          # (N, 2Ho+2, 2Wo+2, C)
    # Free row-major regrouping exposing stride-2 structure:
    #   row  hp = 2*hq + ph  -> dims (Ho+1, 2)
    #   col  wp = 2*wq + pw  -> dims (Wo+1, 2) folded with C into last dim 2*C
    xr = xp.reshape(N, Ho + 1, 2, Wo + 1, 2 * C)

    # torch weight (Cout, Cin, kh, kw) -> (kh, kw, Cin, Cout) -> (9, Cin, Cout)
    w_mat = jnp.transpose(weight_oihw, (2, 3, 1, 0)).reshape(9, C, C)
    b_row = bias.reshape(1, C)

    tho = _pick_row_tile(Ho, Wo, C, x_nchw.dtype.itemsize)
    nb = Ho // tho
    tm = tho * Wo

    out_flat = pl.pallas_call(
        _downsample_kernel,
        out_shape=jax.ShapeDtypeStruct((N, C, Ho * Wo), x_nchw.dtype),
        grid_spec=pltpu.PrefetchScalarGridSpec(
            num_scalar_prefetch=0,
            grid=(N, nb),
            in_specs=[
                # main row block: even+odd padded rows for output rows of block i
                pl.BlockSpec((1, tho, 2, Wo + 1, 2 * C),
                             lambda n, i: (n, i, 0, 0, 0)),
                # boundary even row hq = (i+1)*tHo (needed by kh=2 of last row)
                pl.BlockSpec((1, 1, 1, Wo + 1, 2 * C),
                             lambda n, i: (n, (i + 1) * tho, 0, 0, 0)),
                pl.BlockSpec((9, C, C), lambda n, i: (0, 0, 0)),
                pl.BlockSpec((1, C), lambda n, i: (0, 0)),
            ],
            out_specs=pl.BlockSpec((1, C, tm), lambda n, i: (n, 0, i)),
        ),
        compiler_params=pltpu.CompilerParams(
            dimension_semantics=("parallel", "parallel"),
            vmem_limit_bytes=32 * 1024 * 1024,
        ),
    )(xr, xr, w_mat, b_row)

    # (N, C, Ho*Wo) -> (N, C, Ho, Wo): free reshape, already NCHW.
    out = out_flat.reshape(N, C, Ho, Wo)
    assert out.shape[2] == H // 2 and out.shape[3] == W // 2
    return out


def _reference_forward(x_nchw, weight_oihw, bias):
    """Pure-JAX reference (lax conv) for correctness checking."""
    out = jax.lax.conv_general_dilated(
        x_nchw, weight_oihw,
        window_strides=(2, 2),
        padding=((1, 1), (1, 1)),
        dimension_numbers=("NCHW", "OIHW", "NCHW"),
    )
    return out + bias.reshape(1, -1, 1, 1)


if __name__ == "__main__":
    key = jax.random.PRNGKey(0)
    k_x, k_t, k_w, k_b = jax.random.split(key, 4)

    N, C, H, W = 2, 4, 16, 16
    x = jax.random.normal(k_x, (N, C, H, W), dtype=jnp.float32)
    t = jax.random.normal(k_t, (N, 32), dtype=jnp.float32)  # unused, as in torch

    # Deterministic parameter init (shapes match nn.Conv2d(C, C, 3, 2, 1)).
    weight = jax.random.normal(k_w, (C, C, 3, 3), dtype=jnp.float32) * 0.1
    bias = jax.random.normal(k_b, (C,), dtype=jnp.float32) * 0.1

    y = jax.jit(downsample_forward)(x, t, weight, bias)
    y = jax.block_until_ready(y)

    y_ref = _reference_forward(x, weight, bias)
    assert y.shape == (N, C, H // 2, W // 2)
    assert jnp.allclose(y, y_ref, atol=1e-4, rtol=1e-4)

    print("KERNEL_OK")
</pallas_src>

<mosaic_0001>
module attributes {stable_mosaic.version = 11 : i64} {
  func.func @_downsample_kernel(%arg0: i32, %arg1: i32, %arg2: memref<1x8x2x9x8xf32, #tpu.memory_space<vmem>>, %arg3: memref<1x1x1x9x8xf32, #tpu.memory_space<vmem>>, %arg4: memref<9x4x4xf32, #tpu.memory_space<vmem>>, %arg5: memref<1x4xf32, #tpu.memory_space<vmem>>, %arg6: memref<1x4x64xf32, #tpu.memory_space<vmem>>) attributes {dimension_semantics = [#tpu.dimension_semantics<parallel>, #tpu.dimension_semantics<parallel>], iteration_bounds = array<i64: 2, 1>, scalar_prefetch = 0 : i64, scratch_operands = 0 : i64, tpu.core_type = #tpu.core_type<tc>, window_params = [{transform_indices = @transform_0, window_bounds = array<i64: 1, 8, 2, 9, 8>}, {transform_indices = @transform_1, window_bounds = array<i64: 1, 1, 1, 9, 8>}, {pipeline_mode = #tpu.pipeline_mode<synchronous>, transform_indices = @transform_2, window_bounds = array<i64: 9, 4, 4>}, {pipeline_mode = #tpu.pipeline_mode<synchronous>, transform_indices = @transform_3, window_bounds = array<i64: 1, 4>}, {transform_indices = @transform_4, window_bounds = array<i64: 1, 4, 64>}]} {
    %c0 = arith.constant 0 : index
    %c0_0 = arith.constant 0 : index
    %c0_1 = arith.constant 0 : index
    %c0_2 = arith.constant 0 : index
    %c0_3 = arith.constant 0 : index
    %0 = vector.load %arg2[%c0, %c0_0, %c0_1, %c0_2, %c0_3] : memref<1x8x2x9x8xf32, #tpu.memory_space<vmem>>, vector<1x8x2x9x8xf32>
    %1 = vector.shape_cast %0 : vector<1x8x2x9x8xf32> to vector<8x2x9x8xf32>
    %2 = vector.extract_strided_slice %1 {offsets = [0, 0, 0, 0], sizes = [8, 1, 9, 8], strides = [1, 1, 1, 1]} : vector<8x2x9x8xf32> to vector<8x1x9x8xf32>
    %3 = vector.shape_cast %2 : vector<8x1x9x8xf32> to vector<8x9x8xf32>
    %c0_4 = arith.constant 0 : index
    %c0_5 = arith.constant 0 : index
    %c0_6 = arith.constant 0 : index
    %c0_7 = arith.constant 0 : index
    %c0_8 = arith.constant 0 : index
    %4 = vector.load %arg3[%c0_4, %c0_5, %c0_6, %c0_7, %c0_8] : memref<1x1x1x9x8xf32, #tpu.memory_space<vmem>>, vector<1x1x1x9x8xf32>
    %5 = vector.shape_cast %4 : vector<1x1x1x9x8xf32> to vector<1x9x8xf32>
    %6 = tpu.concatenate %3, %5 in 0 : vector<8x9x8xf32>, vector<1x9x8xf32> -> vector<9x9x8xf32>
    %7 = vector.extract_strided_slice %1 {offsets = [0, 1, 0, 0], sizes = [8, 1, 9, 8], strides = [1, 1, 1, 1]} : vector<8x2x9x8xf32> to vector<8x1x9x8xf32>
    %8 = vector.shape_cast %7 : vector<8x1x9x8xf32> to vector<8x9x8xf32>
    %cst = arith.constant 0.000000e+00 : f32
    %9 = vector.broadcast %cst : f32 to vector<64x4xf32>
    %10 = vector.extract_strided_slice %6 {offsets = [0, 0, 0], sizes = [8, 9, 8], strides = [1, 1, 1]} : vector<9x9x8xf32> to vector<8x9x8xf32>
    %11 = vector.extract_strided_slice %10 {offsets = [0, 0, 0], sizes = [8, 8, 4], strides = [1, 1, 1]} : vector<8x9x8xf32> to vector<8x8x4xf32>
    %12 = vector.shape_cast %11 : vector<8x8x4xf32> to vector<64x4xf32>
    %c0_9 = arith.constant 0 : index
    %c0_10 = arith.constant 0 : index
    %c0_11 = arith.constant 0 : index
    %13 = vector.load %arg4[%c0_9, %c0_10, %c0_11] : memref<9x4x4xf32, #tpu.memory_space<vmem>>, vector<1x4x4xf32>
    %14 = vector.shape_cast %13 : vector<1x4x4xf32> to vector<4x4xf32>
    %cst_12 = arith.constant dense<0.000000e+00> : vector<64x4xf32>
    %15 = tpu.matmul %12, %14, %cst_12 {dimension_numbers = #tpu.dot_dimension_numbers<[1], [0], [0], [1], [0, 0, 1, 1], [], []>} : vector<64x4xf32>, vector<4x4xf32>, vector<64x4xf32> -> vector<64x4xf32>
    %16 = arith.addf %9, %15 : vector<64x4xf32>
    %17 = vector.extract_strided_slice %10 {offsets = [0, 0, 4], sizes = [8, 8, 4], strides = [1, 1, 1]} : vector<8x9x8xf32> to vector<8x8x4xf32>
    %18 = vector.shape_cast %17 : vector<8x8x4xf32> to vector<64x4xf32>
    %c1 = arith.constant 1 : index
    %c0_13 = arith.constant 0 : index
    %c0_14 = arith.constant 0 : index
    %19 = vector.load %arg4[%c1, %c0_13, %c0_14] : memref<9x4x4xf32, #tpu.memory_space<vmem>>, vector<1x4x4xf32>
    %20 = vector.shape_cast %19 : vector<1x4x4xf32> to vector<4x4xf32>
    %cst_15 = arith.constant dense<0.000000e+00> : vector<64x4xf32>
    %21 = tpu.matmul %18, %20, %cst_15 {dimension_numbers = #tpu.dot_dimension_numbers<[1], [0], [0], [1], [0, 0, 1, 1], [], []>} : vector<64x4xf32>, vector<4x4xf32>, vector<64x4xf32> -> vector<64x4xf32>
    %22 = arith.addf %16, %21 : vector<64x4xf32>
    %23 = vector.extract_strided_slice %10 {offsets = [0, 1, 0], sizes = [8, 8, 4], strides = [1, 1, 1]} : vector<8x9x8xf32> to vector<8x8x4xf32>
    %24 = vector.shape_cast %23 : vector<8x8x4xf32> to vector<64x4xf32>
    %c2 = arith.constant 2 : index
    %c0_16 = arith.constant 0 : index
    %c0_17 = arith.constant 0 : index
    %25 = vector.load %arg4[%c2, %c0_16, %c0_17] : memref<9x4x4xf32, #tpu.memory_space<vmem>>, vector<1x4x4xf32>
    %26 = vector.shape_cast %25 : vector<1x4x4xf32> to vector<4x4xf32>
    %cst_18 = arith.constant dense<0.000000e+00> : vector<64x4xf32>
    %27 = tpu.matmul %24, %26, %cst_18 {dimension_numbers = #tpu.dot_dimension_numbers<[1], [0], [0], [1], [0, 0, 1, 1], [], []>} : vector<64x4xf32>, vector<4x4xf32>, vector<64x4xf32> -> vector<64x4xf32>
    %28 = arith.addf %22, %27 : vector<64x4xf32>
    %29 = vector.extract_strided_slice %8 {offsets = [0, 0, 0], sizes = [8, 8, 4], strides = [1, 1, 1]} : vector<8x9x8xf32> to vector<8x8x4xf32>
    %30 = vector.shape_cast %29 : vector<8x8x4xf32> to vector<64x4xf32>
    %c3 = arith.constant 3 : index
    %c0_19 = arith.constant 0 : index
    %c0_20 = arith.constant 0 : index
    %31 = vector.load %arg4[%c3, %c0_19, %c0_20] : memref<9x4x4xf32, #tpu.memory_space<vmem>>, vector<1x4x4xf32>
    %32 = vector.shape_cast %31 : vector<1x4x4xf32> to vector<4x4xf32>
    %cst_21 = arith.constant dense<0.000000e+00> : vector<64x4xf32>
    %33 = tpu.matmul %30, %32, %cst_21 {dimension_numbers = #tpu.dot_dimension_numbers<[1], [0], [0], [1], [0, 0, 1, 1], [], []>} : vector<64x4xf32>, vector<4x4xf32>, vector<64x4xf32> -> vector<64x4xf32>
    %34 = arith.addf %28, %33 : vector<64x4xf32>
    %35 = vector.extract_strided_slice %8 {offsets = [0, 0, 4], sizes = [8, 8, 4], strides = [1, 1, 1]} : vector<8x9x8xf32> to vector<8x8x4xf32>
    %36 = vector.shape_cast %35 : vector<8x8x4xf32> to vector<64x4xf32>
    %c4 = arith.constant 4 : index
    %c0_22 = arith.constant 0 : index
    %c0_23 = arith.constant 0 : index
    %37 = vector.load %arg4[%c4, %c0_22, %c0_23] : memref<9x4x4xf32, #tpu.memory_space<vmem>>, vector<1x4x4xf32>
    %38 = vector.shape_cast %37 : vector<1x4x4xf32> to vector<4x4xf32>
    %cst_24 = arith.constant dense<0.000000e+00> : vector<64x4xf32>
    %39 = tpu.matmul %36, %38, %cst_24 {dimension_numbers = #tpu.dot_dimension_numbers<[1], [0], [0], [1], [0, 0, 1, 1], [], []>} : vector<64x4xf32>, vector<4x4xf32>, vector<64x4xf32> -> vector<64x4xf32>
    %40 = arith.addf %34, %39 : vector<64x4xf32>
    %41 = vector.extract_strided_slice %8 {offsets = [0, 1, 0], sizes = [8, 8, 4], strides = [1, 1, 1]} : vector<8x9x8xf32> to vector<8x8x4xf32>
    %42 = vector.shape_cast %41 : vector<8x8x4xf32> to vector<64x4xf32>
    %c5 = arith.constant 5 : index
    %c0_25 = arith.constant 0 : index
    %c0_26 = arith.constant 0 : index
    %43 = vector.load %arg4[%c5, %c0_25, %c0_26] : memref<9x4x4xf32, #tpu.memory_space<vmem>>, vector<1x4x4xf32>
    %44 = vector.shape_cast %43 : vector<1x4x4xf32> to vector<4x4xf32>
    %cst_27 = arith.constant dense<0.000000e+00> : vector<64x4xf32>
    %45 = tpu.matmul %42, %44, %cst_27 {dimension_numbers = #tpu.dot_dimension_numbers<[1], [0], [0], [1], [0, 0, 1, 1], [], []>} : vector<64x4xf32>, vector<4x4xf32>, vector<64x4xf32> -> vector<64x4xf32>
    %46 = arith.addf %40, %45 : vector<64x4xf32>
    %47 = vector.extract_strided_slice %6 {offsets = [1, 0, 0], sizes = [8, 9, 8], strides = [1, 1, 1]} : vector<9x9x8xf32> to vector<8x9x8xf32>
    %48 = vector.extract_strided_slice %47 {offsets = [0, 0, 0], sizes = [8, 8, 4], strides = [1, 1, 1]} : vector<8x9x8xf32> to vector<8x8x4xf32>
    %49 = vector.shape_cast %48 : vector<8x8x4xf32> to vector<64x4xf32>
    %c6 = arith.constant 6 : index
    %c0_28 = arith.constant 0 : index
    %c0_29 = arith.constant 0 : index
    %50 = vector.load %arg4[%c6, %c0_28, %c0_29] : memref<9x4x4xf32, #tpu.memory_space<vmem>>, vector<1x4x4xf32>
    %51 = vector.shape_cast %50 : vector<1x4x4xf32> to vector<4x4xf32>
    %cst_30 = arith.constant dense<0.000000e+00> : vector<64x4xf32>
    %52 = tpu.matmul %49, %51, %cst_30 {dimension_numbers = #tpu.dot_dimension_numbers<[1], [0], [0], [1], [0, 0, 1, 1], [], []>} : vector<64x4xf32>, vector<4x4xf32>, vector<64x4xf32> -> vector<64x4xf32>
    %53 = arith.addf %46, %52 : vector<64x4xf32>
    %54 = vector.extract_strided_slice %47 {offsets = [0, 0, 4], sizes = [8, 8, 4], strides = [1, 1, 1]} : vector<8x9x8xf32> to vector<8x8x4xf32>
    %55 = vector.shape_cast %54 : vector<8x8x4xf32> to vector<64x4xf32>
    %c7 = arith.constant 7 : index
    %c0_31 = arith.constant 0 : index
    %c0_32 = arith.constant 0 : index
    %56 = vector.load %arg4[%c7, %c0_31, %c0_32] : memref<9x4x4xf32, #tpu.memory_space<vmem>>, vector<1x4x4xf32>
    %57 = vector.shape_cast %56 : vector<1x4x4xf32> to vector<4x4xf32>
    %cst_33 = arith.constant dense<0.000000e+00> : vector<64x4xf32>
    %58 = tpu.matmul %55, %57, %cst_33 {dimension_numbers = #tpu.dot_dimension_numbers<[1], [0], [0], [1], [0, 0, 1, 1], [], []>} : vector<64x4xf32>, vector<4x4xf32>, vector<64x4xf32> -> vector<64x4xf32>
    %59 = arith.addf %53, %58 : vector<64x4xf32>
    %60 = vector.extract_strided_slice %47 {offsets = [0, 1, 0], sizes = [8, 8, 4], strides = [1, 1, 1]} : vector<8x9x8xf32> to vector<8x8x4xf32>
    %61 = vector.shape_cast %60 : vector<8x8x4xf32> to vector<64x4xf32>
    %c8 = arith.constant 8 : index
    %c0_34 = arith.constant 0 : index
    %c0_35 = arith.constant 0 : index
    %62 = vector.load %arg4[%c8, %c0_34, %c0_35] : memref<9x4x4xf32, #tpu.memory_space<vmem>>, vector<1x4x4xf32>
    %63 = vector.shape_cast %62 : vector<1x4x4xf32> to vector<4x4xf32>
    %cst_36 = arith.constant dense<0.000000e+00> : vector<64x4xf32>
    %64 = tpu.matmul %61, %63, %cst_36 {dimension_numbers = #tpu.dot_dimension_numbers<[1], [0], [0], [1], [0, 0, 1, 1], [], []>} : vector<64x4xf32>, vector<4x4xf32>, vector<64x4xf32> -> vector<64x4xf32>
    %65 = arith.addf %59, %64 : vector<64x4xf32>
    %c0_37 = arith.constant 0 : index
    %c0_38 = arith.constant 0 : index
    %66 = vector.load %arg5[%c0_37, %c0_38] : memref<1x4xf32, #tpu.memory_space<vmem>>, vector<1x4xf32>
    %67 = vector.broadcast %66 : vector<1x4xf32> to vector<64x4xf32>
    %68 = arith.addf %65, %67 : vector<64x4xf32>
    %69 = tpu.transpose %68, [1, 0] : vector<64x4xf32> -> vector<4x64xf32>
    %c0_39 = arith.constant 0 : index
    %c0_40 = arith.constant 0 : index
    %c0_41 = arith.constant 0 : index
    %70 = vector.load %arg6[%c0_39, %c0_40, %c0_41] : memref<1x4x64xf32, #tpu.memory_space<vmem>>, vector<1x4x64xf32>
    %71 = vector.shape_cast %70 : vector<1x4x64xf32> to vector<4x64xf32>
    %72 = vector.shape_cast %69 : vector<4x64xf32> to vector<1x4x64xf32>
    tpu.vector_store %arg6[%c0_39, %c0_40, %c0_41], %72 {strides = array<i32>} : memref<1x4x64xf32, #tpu.memory_space<vmem>>, vector<1x4x64xf32>,
    return
  }
  func.func @transform_0(%arg0: i32, %arg1: i32) -> (i32, i32, i32, i32, i32) {
    %c0_i32 = arith.constant 0 : i32
    %c0_i32_0 = arith.constant 0 : i32
    %c0_i32_1 = arith.constant 0 : i32
    %c0_i32_2 = arith.constant 0 : i32
    return %arg0, %arg1, %c0_i32, %c0_i32_0, %c0_i32_1 : i32, i32, i32, i32, i32
  }
  func.func @transform_1(%arg0: i32, %arg1: i32) -> (i32, i32, i32, i32, i32) {
    %c1_i32 = arith.constant 1 : i32
    %0 = arith.addi %arg1, %c1_i32 : i32
    %c8_i32 = arith.constant 8 : i32
    %1 = arith.muli %0, %c8_i32 : i32
    %c0_i32 = arith.constant 0 : i32
    %c0_i32_0 = arith.constant 0 : i32
    %c0_i32_1 = arith.constant 0 : i32
    %c0_i32_2 = arith.constant 0 : i32
    return %arg0, %1, %c0_i32, %c0_i32_0, %c0_i32_1 : i32, i32, i32, i32, i32
  }
  func.func @transform_2(%arg0: i32, %arg1: i32) -> (i32, i32, i32) {
    %c0_i32 = arith.constant 0 : i32
    %c0_i32_0 = arith.constant 0 : i32
    %c0_i32_1 = arith.constant 0 : i32
    %c0_i32_2 = arith.constant 0 : i32
    return %c0_i32, %c0_i32_0, %c0_i32_1 : i32, i32, i32
  }
  func.func @transform_3(%arg0: i32, %arg1: i32) -> (i32, i32) {
    %c0_i32 = arith.constant 0 : i32
    %c0_i32_0 = arith.constant 0 : i32
    %c0_i32_1 = arith.constant 0 : i32
    return %c0_i32, %c0_i32_0 : i32, i32
  }
  func.func @transform_4(%arg0: i32, %arg1: i32) -> (i32, i32, i32) {
    %c0_i32 = arith.constant 0 : i32
    %c0_i32_0 = arith.constant 0 : i32
    return %arg0, %c0_i32, %arg1 : i32, i32, i32
  }
}

</mosaic_0001>

<bundles_post_ra>
// kernel: downsample_forward.1
= control target key start
LH: loop header
LB: loop body
LE: loop exit
PB: predicated region body
PF: predicated region fallthrough
CT: control target
= control target key end

     0   :  { %s1371_s15 = smov 0   ;;  %s1373_s16 = smov 0   ;;  %s1822_s0 = inlined_call_operand.vmem [shape: f32[2,9,2,9,8], index: 0, kind: input, shape index: {}, may-alias: {0,1}]   ;;  %s1823_s1 = inlined_call_operand.vmem [shape: f32[2,9,2,9,8], index: 1, kind: input, shape index: {}, may-alias: {0,1}]   ;;  %s1824_s2 = inlined_call_operand.vmem [shape: f32[9,4,4], index: 2, kind: input, shape index: {}]   ;;  %s1825_s3 = inlined_call_operand.vmem [shape: f32[1,4], index: 3, kind: input, shape index: {}]   ;;  %s1826_s4 = inlined_call_operand.vmem [shape: f32[2,4,64], index: 4, kind: output, shape index: {}]  }
   0x1   :  { %s1375_s17 = smov 0  }
   0x2 LB: > { %s26_s18 = sadd.s32 1, %s1339_s16  ;;  %p1191_p0 = scmp.ge.s32.totalorder %s1343_s17, 1  ;;  %s1343_s17 = sphi %s1375_s17, %s14_s17   ;;  %s1339_s16 = sphi %s1373_s16, %s1828_s16   ;;  %s1335_s15 = sphi %s1371_s15, %s1827_s15  }
   0x3   : > { %p28_p1 = scmp.ge.s32.totalorder %s26_s18, 2  ;;  %p220_p2 = scmp.lt.s32.totalorder %s1343_s17, 3 }
   0x5   : > { %s1830_s18 = smov (%p28_p1, %s26_s18), 0  ;;  %p221_p3 = pnand %p1191_p0, %p220_p2 }
   0x6   : > { %p277_p4 = scmp.lt.s32.totalorder (!%p221_p3), %s1335_s15, 1  ;;  %s1345_s23 = smov (!%p221_p3), 124  }
   0x7   : > { %224 = sbr.rel (%p221_p3) target bundleno = 513 (0x201), region = 36 }
   0xc   : > { %s1832_s15 = smov (!%p277_p4, %s1335_s15), 1  ;;  %v1195_v6 = vld [vmem:[%s1824_s2 + $0x4] sm:$0xf]  ;;  %vm391_vm0 = vcmask 1043456   ;;  %v1214_v17 = vld [vmem:[%s1824_s2 + $0x8] sm:$0xf] }
   0xd   : > { %s1291_s19 = smul.u32 288, %s1832_s15  ;;  %1289 = vmatpush.msk.msra.mxu2 %vm391_vm0, %v1195_v6  ;;  %1288 = vmatpush.msk.msra.mxu1 %vm391_vm0, %v1195_v6  ;;  %v1224_v18 = vld [vmem:[%s1824_s2 + $0xc] sm:$0xf]  ;;  %v347_v19 = vld [vmem:[%s1824_s2] sm:$0xf]  ;;  %vm374_vm1 = vcmask 31744  }
   0xe   : > { %1196 = vmatpush.msk.msra.mxu0 %vm391_vm0, %v1195_v6  ;;  %1290 = vmatpush.msk.msra.mxu3 %vm391_vm0, %v1195_v6  ;;  %v1234_v21 = vld [vmem:[%s1824_s2 + $0x10] sm:$0xf]  ;;  %v1254_v23 = vld [vmem:[%s1824_s2 + $0x18] sm:$0xf]  ;;  %v1244_v24 = vld [vmem:[%s1824_s2 + $0x14] sm:$0xf] }
   0xf   : > { %s1397_s22 = scalar_lea.vmem %s1822_s0, %s1291_s19  ;;  %1215 = vmatpush.msk.msrb.mxu2 %vm391_vm0, %v1214_v17  ;;  %1205 = vmatpush.msk.msrb.mxu1 %vm391_vm0, %v347_v19  ;;  %s1287_s8 = sadd.s32 256, %s1291_s19  ;;  %v1274_v27 = vld [vmem:[%s1824_s2 + $0x20] sm:$0xf]  ;;  %v1264_v28 = vld [vmem:[%s1824_s2 + $0x1c] sm:$0xf]  ;;  %vm504_vm2 = vcmask 1046528  }
  0x10   : > { %v1400_v0 = vld [vmem:[%s1397_s22 + $0x80] sm:$0xff]  ;;  %v1443_v9 = vld [vmem:[%s1397_s22 + $0x10] sm:$0xff]  ;;  %1225 = vmatpush.msk.msrb.mxu3 %vm391_vm0, %v1224_v18  ;;  %1235 = vmatpush.msk.msrb.mxu0 %vm391_vm0, %v1234_v21  ;;  %s1508_s11 = scalar_lea.vmem %s1823_s1, %s1287_s8  ;;  %v314_v31 = vld [vmem:[%s1397_s22 + $0x8] sm:$0x1]  ;;  %s1194_s26 = sshll.u32 %s1832_s15, 2  ;;  %vm1084_vm3 = vcmask 519168  }
  0x11   : > { %v1403_v1 = vld [vmem:[%s1397_s22 + $0x40] sm:$0xff]  ;;  %366 = vrot.lane.b32.xlu0 %v1400_v0, %s1345_s23  ;;  %v1452_v10 = vld [vmem:[%s1397_s22 + $0x30] sm:$0xff]  ;;  %v506_v33 = vrot.slane %v314_v31, 1  ;;  %v318_v38 = vld [vmem:[%s1397_s22 + $0x28] sm:$0x1]  ;;  %v517_v54 = vrot.slane %v1400_v0, 1  ;;  %s312_s29 = scalar_lea.vmem %s1826_s4, %s1194_s26 }
  0x12   : > { %362 = vrot.lane.b32.xlu1 %v1403_v1, %s1345_s23  ;;  %v1410_v2 = vld [vmem:[%s1397_s22] sm:$0xff]  ;;  %v1455_v11 = vld [vmem:[%s1397_s22 + $0x50] sm:$0xff]  ;;  %v509_v40 = vrot.slane %v318_v38, 1  ;;  %v322_v43 = vld [vmem:[%s1397_s22 + $0x48] sm:$0x1]  ;;  %v511_v44 = vrot.slane %v1403_v1, 1 }
  0x13   : > { %358 = vrot.lane.b32.xlu2 %v1410_v2, %s1345_s23  ;;  %v1415_v3 = vld [vmem:[%s1397_s22 + $0xc0] sm:$0xff]  ;;  %v1458_v12 = vld [vmem:[%s1397_s22 + $0x70] sm:$0xff]  ;;  %v505_v32 = vrot.slane %v1410_v2, 1  ;;  %v512_v45 = vrot.slane %v322_v43, 1  ;;  %v326_v48 = vld [vmem:[%s1397_s22 + $0x68] sm:$0x1] }
  0x14   : > { %v1418_v4 = vld [vmem:[%s1397_s22 + $0xa0] sm:$0xff]  ;;  %v1467_v13 = vld [vmem:[%s1397_s22 + $0x90] sm:$0xff]  ;;  %v515_v50 = vrot.slane %v326_v48, 1  ;;  %v330_v53 = vld [vmem:[%s1397_s22 + $0x88] sm:$0x1]  ;;  %v771_v31 = vrot.slane %v1443_v9, 1 }
  0x15   : > { %v1421_v5 = vld [vmem:[%s1397_s22 + $0xe0] sm:$0xff]  ;;  %v1470_v14 = vld [vmem:[%s1397_s22 + $0xb0] sm:$0xff]  ;;  %v507_v35 = vsel %vm504_vm2, %v505_v32, %v506_v33  ;;  %v1578_v46 = vsel %vm504_vm2, %v511_v44, %v512_v45  ;;  %v518_v55 = vrot.slane %v330_v53, 1  ;;  %v334_v58 = vld [vmem:[%s1397_s22 + $0xa8] sm:$0x1]  ;;  %v520_v59 = vrot.slane %v1418_v4, 1 }
  0x16   : > { %v1437_v7 = vld [vmem:[%s1397_s22 + $0x60] sm:$0xff]  ;;  %v1473_v15 = vld [vmem:[%s1397_s22 + $0xd0] sm:$0xff]  ;;  %v521_v60 = vrot.slane %v334_v58, 1  ;;  %v338_v63 = vld [vmem:[%s1397_s22 + $0xc8] sm:$0x1]  ;;  %v774_v38 = vrot.slane %v1452_v10, 1 }
  0x17   : > { %v1440_v8 = vld [vmem:[%s1397_s22 + $0x20] sm:$0xff]  ;;  %v1482_v16 = vld [vmem:[%s1397_s22 + $0xf0] sm:$0xff]  ;;  %v514_v49 = vrot.slane %v1437_v7, 1  ;;  %v1602_v56 = vsel %vm504_vm2, %v517_v54, %v518_v55  ;;  %v524_v6 = vrot.slane %v338_v63, 1  ;;  %v342_v19 = vld [vmem:[%s1397_s22 + $0xe8] sm:$0x1] }
  0x18   : > { %v1511_v22 = vld [vmem:[%s1508_s11] sm:$0xff]  ;;  %v508_v39 = vrot.slane %v1440_v8, 1  ;;  %v1614_v61 = vsel %vm504_vm2, %v520_v59, %v521_v60  ;;  %v527_v21 = vrot.slane %v342_v19, 1  ;;  %v786_v43 = vrot.slane %v1470_v14, 1  ;;  %v346_v48 = vld [vmem:[%s1508_s11 + $0x8] sm:$0x1] }
  0x19   : > { %370 = vrot.lane.b32.xlu0 %v1415_v3, %s1345_s23  ;;  %v1590_v51 = vsel %vm504_vm2, %v514_v49, %v515_v50  ;;  %v982_v49 = vrot.slane %v346_v48, 1  ;;  %v1779_v48 = vld [vmem:[%s1825_s3] ss:$0 sm:$0xff] }
  0x1a   : > { %368 = vrot.lane.b32.xlu1 %v1418_v4, %s1345_s23  ;;  %v1566_v41 = vsel %vm504_vm2, %v508_v39, %v509_v40  ;;  %v324_v39 = vld [vmem:[%s1397_s22 + $0x58] sm:$0x1] }
  0x1b   : > { %372 = vrot.lane.b32.xlu2 %v1421_v5, %s1345_s23  ;;  %v328_v40 = vld [vmem:[%s1397_s22 + $0x78] sm:$0x1] }
  0x21   : > { %364 = vrot.lane.b32.xlu0 %v1437_v7, %s1345_s23 }
  0x22   : > { %360 = vrot.lane.b32.xlu1 %v1440_v8, %s1345_s23 }
  0x23   : > { %679 = vrot.lane.b32.xlu2 %v1443_v9, %s1345_s23 }
  0x29   : > { %681 = vrot.lane.b32.xlu0 %v1452_v10, %s1345_s23 }
  0x2a   : > { %683 = vrot.lane.b32.xlu1 %v1455_v11, %s1345_s23 }
  0x2b   : > { %685 = vrot.lane.b32.xlu2 %v1458_v12, %s1345_s23 }
  0x31   : > { %687 = vrot.lane.b32.xlu0 %v1467_v13, %s1345_s23 }
  0x32   : > { %689 = vrot.lane.b32.xlu1 %v1470_v14, %s1345_s23 }
  0x33   : > { %691 = vrot.lane.b32.xlu2 %v1473_v15, %s1345_s23 }
  0x39   : > { %693 = vrot.lane.b32.xlu0 %v1482_v16, %s1345_s23 }
  0x3a   : > { %924 = vrot.lane.b32.xlu1 %v1511_v22, %s1345_s23 }
  0x6d   : > { %v359_v20 = vpop.permute.xlu2 %358 }
  0x6e   : > { %1197 = vmatmul.msk.f32.vlgmr.msra.gmra.mxu0 %vm374_vm1, %v359_v20  ;;  %v526_v20 = vrot.slane %v1421_v5, 1 }
  0x6f   : > { %1275 = vmatpush.msk.msra.mxu0 %vm391_vm0, %v1274_v27 }
  0x75   : > { %v1549_v34 = vpop.permute.xlu2 %372 }
  0x7d   : > { %v680_v42 = vpop.permute.xlu2 %679 }
  0x83   : > { %v1521_v25 = vpop.permute.xlu0 %366 }
  0x84   : > { %v1523_v26 = vpop.permute.xlu1 %362  ;;  %1201 = vmatmul.msk.f32.vlgmr.msra.gmra.mxu2 %vm374_vm1, %v1521_v25 }
  0x85   : > { %1199 = vmatmul.msk.f32.vlgmr.msra.gmra.mxu1 %vm374_vm1, %v1523_v26  ;;  %1255 = vmatpush.msk.msra.mxu2 %vm391_vm0, %v1254_v23  ;;  %v686_v57 = vpop.permute.xlu2 %685  ;;  %v1638_v23 = vsel %vm504_vm2, %v526_v20, %v527_v21 }
  0x86   : > { %1245 = vmatpush.msk.msra.mxu1 %vm391_vm0, %v1244_v24 }
  0x8b   : > { %v1538_v29 = vpop.permute.xlu0 %370 }
  0x8c   : > { %v1540_v30 = vpop.permute.xlu1 %368  ;;  %1203 = vmatmul.msk.f32.vlgmr.msra.gmra.mxu3 %vm374_vm1, %v1538_v29 }
  0x8d   : > { %1202 = vmatmul.msk.f32.gmra.mxu2 %vm374_vm1, %v1540_v30  ;;  %1265 = vmatpush.msk.msra.mxu3 %vm391_vm0, %v1264_v28  ;;  %v692_v24 = vpop.permute.xlu2 %691  ;;  %v316_v28 = vld [vmem:[%s1397_s22 + $0x18] sm:$0x1] }
  0x8e   : > { %v772_v32 = vrot.slane %v316_v28, 1 }
  0x90   : > { %v773_v33 = vsel %vm504_vm2, %v771_v31, %v772_v32 }
  0x93   : > { %v1552_v36 = vpop.permute.xlu0 %364 }
  0x94   : > { %v1554_v37 = vpop.permute.xlu1 %360  ;;  %1200 = vmatmul.msk.f32.gmra.mxu1 %vm374_vm1, %v1552_v36  ;;  %1204 = vmatmul.msk.f32.gmra.mxu3 %vm374_vm1, %v1549_v34 }
  0x95   : > { %1216 = vmatmul.msk.f32.vlgmr.msrb.gmra.mxu2 %vm374_vm1, %v507_v35  ;;  %1198 = vmatmul.msk.f32.gmra.mxu0 %vm374_vm1, %v1554_v37  ;;  %v320_v35 = vld [vmem:[%s1397_s22 + $0x38] sm:$0x1] }
  0x9b   : > { %v682_v47 = vpop.permute.xlu0 %681 }
  0x9c   : > { %1206 = vmatmul.msk.f32.vlgmr.msrb.gmra.mxu1 %vm374_vm1, %v1410_v2  ;;  %1226 = vmatmul.msk.f32.vlgmr.msrb.gmra.mxu3 %vm374_vm1, %v1443_v9  ;;  %v684_v52 = vpop.permute.xlu1 %683  ;;  %v523_v2 = vrot.slane %v1415_v3, 1  ;;  %v775_v9 = vrot.slane %v320_v35, 1 }
  0x9d   : > { %1217 = vmatmul.msk.f32.gmra.mxu2 %vm374_vm1, %v1566_v41  ;;  %1236 = vmatmul.msk.f32.vlgmr.msrb.gmra.mxu0 %vm374_vm1, %v680_v42  ;;  %v336_v42 = vld [vmem:[%s1397_s22 + $0xb8] sm:$0x1] }
  0x9e   : > { %v1626_v17 = vsel %vm504_vm2, %v523_v2, %v524_v6 }
  0xa3   : > { %v688_v62 = vpop.permute.xlu0 %687 }
  0xa4   : > { %1207 = vmatmul.msk.f32.gmra.mxu1 %vm374_vm1, %v1440_v8  ;;  %1227 = vmatmul.msk.f32.gmra.mxu3 %vm374_vm1, %v1452_v10  ;;  %v690_v18 = vpop.permute.xlu1 %689  ;;  %v778_v10 = vrot.slane %v324_v39, 1 }
  0xa5   : > { %1218 = vmatmul.msk.f32.gmra.mxu2 %vm374_vm1, %v1578_v46  ;;  %1237 = vmatmul.msk.f32.gmra.mxu0 %vm374_vm1, %v682_v47  ;;  %v344_v47 = vld [vmem:[%s1397_s22 + $0xf8] sm:$0x1] }
  0xab   : > { %v694_v27 = vpop.permute.xlu0 %693 }
  0xac   : > { %1208 = vmatmul.msk.f32.gmra.mxu1 %vm374_vm1, %v1403_v1  ;;  %1228 = vmatmul.msk.f32.gmra.mxu3 %vm374_vm1, %v1455_v11  ;;  %v925_v53 = vpop.permute.xlu1 %924 }
  0xad   : > { %1219 = vmatmul.msk.f32.gmra.mxu2 %vm374_vm1, %v1590_v51  ;;  %1238 = vmatmul.msk.f32.gmra.mxu0 %vm374_vm1, %v684_v52 }
  0xb4   : > { %1209 = vmatmul.msk.f32.gmra.mxu1 %vm374_vm1, %v1437_v7  ;;  %1229 = vmatmul.msk.f32.gmra.mxu3 %vm374_vm1, %v1458_v12 }
  0xb5   : > { %1220 = vmatmul.msk.f32.gmra.mxu2 %vm374_vm1, %v1602_v56  ;;  %1239 = vmatmul.msk.f32.gmra.mxu0 %vm374_vm1, %v686_v57 }
  0xbc   : > { %1210 = vmatmul.msk.f32.gmra.mxu1 %vm374_vm1, %v1400_v0  ;;  %1230 = vmatmul.msk.f32.gmra.mxu3 %vm374_vm1, %v1467_v13 }
  0xbd   : > { %1221 = vmatmul.msk.f32.gmra.mxu2 %vm374_vm1, %v1614_v61  ;;  %1240 = vmatmul.msk.f32.gmra.mxu0 %vm374_vm1, %v688_v62 }
  0xc4   : > { %1211 = vmatmul.msk.f32.gmra.mxu1 %vm374_vm1, %v1418_v4  ;;  %1231 = vmatmul.msk.f32.gmra.mxu3 %vm374_vm1, %v1470_v14 }
  0xc5   : > { %1222 = vmatmul.msk.f32.gmra.mxu2 %vm374_vm1, %v1626_v17  ;;  %1241 = vmatmul.msk.f32.gmra.mxu0 %vm374_vm1, %v690_v18 }
  0xcc   : > { %1212 = vmatmul.msk.f32.gmra.mxu1 %vm374_vm1, %v1415_v3  ;;  %1232 = vmatmul.msk.f32.gmra.mxu3 %vm374_vm1, %v1473_v15 }
  0xcd   : > { %1223 = vmatmul.msk.f32.gmra.mxu2 %vm374_vm1, %v1638_v23  ;;  %1242 = vmatmul.msk.f32.gmra.mxu0 %vm374_vm1, %v692_v24 }
  0xd4   : > { %1213 = vmatmul.msk.f32.gmra.mxu1 %vm374_vm1, %v1421_v5  ;;  %1233 = vmatmul.msk.f32.gmra.mxu3 %vm374_vm1, %v1482_v16 }
  0xd5   : > { %1256 = vmatmul.msk.f32.vlgmr.msra.gmra.mxu2 %vm374_vm1, %v1440_v8  ;;  %1243 = vmatmul.msk.f32.gmra.mxu0 %vm374_vm1, %v694_v27  ;;  %v776_v8 = vsel %vm504_vm2, %v774_v38, %v775_v9 }
  0xdc   : > { %1246 = vmatmul.msk.f32.vlgmr.msra.gmra.mxu1 %vm374_vm1, %v773_v33  ;;  %1266 = vmatmul.msk.f32.vlgmr.msra.gmra.mxu3 %vm374_vm1, %v1554_v37  ;;  %v777_v37 = vrot.slane %v1455_v11, 1  ;;  %v781_v11 = vrot.slane %v328_v40, 1 }
  0xdd   : > { %1257 = vmatmul.msk.f32.gmra.mxu2 %vm374_vm1, %v1403_v1  ;;  %1276 = vmatmul.msk.f32.vlgmr.msra.gmra.mxu0 %vm374_vm1, %v1566_v41  ;;  %v332_v41 = vld [vmem:[%s1397_s22 + $0x98] sm:$0x1] }
  0xde   : > { %v779_v1 = vsel %vm504_vm2, %v777_v37, %v778_v10 }
  0xe4   : > { %1247 = vmatmul.msk.f32.gmra.mxu1 %vm374_vm1, %v776_v8  ;;  %1267 = vmatmul.msk.f32.gmra.mxu3 %vm374_vm1, %v1523_v26  ;;  %v780_v26 = vrot.slane %v1458_v12, 1  ;;  %v784_v12 = vrot.slane %v332_v41, 1 }
  0xe5   : > { %1258 = vmatmul.msk.f32.gmra.mxu2 %vm374_vm1, %v1437_v7  ;;  %1277 = vmatmul.msk.f32.gmra.mxu0 %vm374_vm1, %v1578_v46 }
  0xe6   : > { %v782_v7 = vsel %vm504_vm2, %v780_v26, %v781_v11 }
  0xeb   : > { %v412_v46 = vpop.f32.mrf.mxu0 }
  0xec   : > { %1248 = vmatmul.msk.f32.gmra.mxu1 %vm374_vm1, %v779_v1  ;;  %1268 = vmatmul.msk.f32.gmra.mxu3 %vm374_vm1, %v1552_v36  ;;  %v783_v36 = vrot.slane %v1467_v13, 1 }
  0xed   : > { %1259 = vmatmul.msk.f32.gmra.mxu2 %vm374_vm1, %v1400_v0  ;;  %1278 = vmatmul.msk.f32.gmra.mxu0 %vm374_vm1, %v1590_v51 }
  0xee   : > { %v785_v0 = vsel %vm504_vm2, %v783_v36, %v784_v12 }
  0xf4   : > { %1249 = vmatmul.msk.f32.gmra.mxu1 %vm374_vm1, %v782_v7  ;;  %1269 = vmatmul.msk.f32.gmra.mxu3 %vm374_vm1, %v1521_v25  ;;  %v340_v25 = vld [vmem:[%s1397_s22 + $0xd8] sm:$0x1] }
  0xf5   : > { %1260 = vmatmul.msk.f32.gmra.mxu2 %vm374_vm1, %v1418_v4  ;;  %1279 = vmatmul.msk.f32.gmra.mxu0 %vm374_vm1, %v1602_v56  ;;  %v787_v4 = vrot.slane %v336_v42, 1  ;;  %v790_v14 = vrot.slane %v340_v25, 1 }
  0xf7   : > { %v788_v13 = vsel %vm504_vm2, %v786_v43, %v787_v4 }
  0xfc   : > { %1250 = vmatmul.msk.f32.gmra.mxu1 %vm374_vm1, %v785_v0  ;;  %1270 = vmatmul.msk.f32.gmra.mxu3 %vm374_vm1, %v1540_v30  ;;  %v789_v30 = vrot.slane %v1473_v15, 1  ;;  %v793_v15 = vrot.slane %v344_v47, 1 }
  0xfd   : > { %1261 = vmatmul.msk.f32.gmra.mxu2 %vm374_vm1, %v1415_v3  ;;  %1280 = vmatmul.msk.f32.gmra.mxu0 %vm374_vm1, %v1614_v61 }
  0xfe   : > { %v791_v45 = vsel %vm504_vm2, %v789_v30, %v790_v14 }
 0x102   : > { %v1718_v44 = vpop.f32.mrf.mxu1 }
 0x104   : > { %1251 = vmatmul.msk.f32.gmra.mxu1 %vm374_vm1, %v788_v13  ;;  %1271 = vmatmul.msk.f32.gmra.mxu3 %vm374_vm1, %v1538_v29  ;;  %v981_v29 = vrot.slane %v1511_v22, 1 }
 0x105   : > { %1262 = vmatmul.msk.f32.gmra.mxu2 %vm374_vm1, %v1421_v5  ;;  %1281 = vmatmul.msk.f32.gmra.mxu0 %vm374_vm1, %v1626_v17  ;;  %v792_v5 = vrot.slane %v1482_v16, 1 }
 0x106   : > { %v983_v54 = vsel %vm504_vm2, %v981_v29, %v982_v49 }
 0x107   : > { %v1716_v3 = vpop.f32.mrf.mxu2 }
 0x10c   : > { %1252 = vmatmul.msk.f32.gmra.mxu1 %vm374_vm1, %v791_v45  ;;  %1272 = vmatmul.msk.f32.gmra.mxu3 %vm374_vm1, %v1549_v34  ;;  %v794_v34 = vsel %vm504_vm2, %v792_v5, %v793_v15 }
 0x10d   : > { %1263 = vmatmul.msk.f32.gmra.mxu2 %vm374_vm1, %v1511_v22  ;;  %1282 = vmatmul.msk.f32.gmra.mxu0 %vm374_vm1, %v1638_v23 }
 0x10f   : > { %v1732_v50 = vpop.f32.mrf.mxu3 }
 0x110   : > { %v1734_v51 = vpop.f32.mrf.mxu2 }
 0x111   : > { %v1736_v52 = vpop.f32.mrf.mxu1 }
 0x112   : > { %v415_v16 = vpop.f32.mrf.mxu0 }
 0x114   : > { %1253 = vmatmul.msk.f32.gmra.mxu1 %vm374_vm1, %v794_v34  ;;  %1273 = vmatmul.msk.f32.gmra.mxu3 %vm374_vm1, %v925_v53 }
 0x115   : > { %1283 = vmatmul.msk.f32.gmra.mxu0 %vm374_vm1, %v983_v54 }
 0x117   : > { %v1743_v22 = vpop.f32.mrf.mxu3 }
 0x118   : > { %v567_v55 = vpop.f32.mrf.mxu2 }
 0x119   : > { %v472_v56 = vpop.f32.mrf.mxu1 }
 0x11a   : > { %v731_v57 = vpop.f32.mrf.mxu0  ;;  %v473_v39 = vadd.f32 %v472_v56, %v412_v46 }
 0x11c   : > { %v591_v40 = vadd.f32 %v567_v55, %v473_v39 }
 0x11f   : > { %v645_v58 = vpop.f32.mrf.mxu3 }
 0x120   : > { %v570_v59 = vpop.f32.mrf.mxu2  ;;  %v669_v11 = vadd.f32 %v645_v58, %v591_v40 }
 0x121   : > { %v475_v60 = vpop.f32.mrf.mxu1 }
 0x122   : > { %v734_v61 = vpop.f32.mrf.mxu0  ;;  %v476_v7 = vadd.f32 %v475_v60, %v415_v16  ;;  %v755_v36 = vadd.f32 %v731_v57, %v669_v11 }
 0x124   : > { %v592_v42 = vadd.f32 %v570_v59, %v476_v7 }
 0x127   : > { %v648_v62 = vpop.f32.mrf.mxu3 }
 0x128   : > { %v573_v63 = vpop.f32.mrf.mxu2  ;;  %v670_v13 = vadd.f32 %v648_v62, %v592_v42 }
 0x129   : > { %v478_v2 = vpop.f32.mrf.mxu1 }
 0x12a   : > { %v737_v6 = vpop.f32.mrf.mxu0  ;;  %v479_v25 = vadd.f32 %v478_v2, %v1718_v44  ;;  %v756_v45 = vadd.f32 %v734_v61, %v670_v13 }
 0x12c   : > { %v593_v15 = vadd.f32 %v573_v63, %v479_v25 }
 0x12f   : > { %v651_v17 = vpop.f32.mrf.mxu3 }
 0x130   : > { %v576_v18 = vpop.f32.mrf.mxu2  ;;  %v671_v34 = vadd.f32 %v651_v17, %v593_v15 }
 0x131   : > { %v481_v19 = vpop.f32.mrf.mxu1 }
 0x132   : > { %v740_v20 = vpop.f32.mrf.mxu0  ;;  %v482_v44 = vadd.f32 %v481_v19, %v1736_v52  ;;  %v757_v56 = vadd.f32 %v737_v6, %v671_v34 }
 0x134   : > { %v594_v60 = vadd.f32 %v576_v18, %v482_v44 }
 0x137   : > { %v654_v21 = vpop.f32.mrf.mxu3 }
 0x138   : > { %v1745_v23 = vpop.f32.mrf.mxu2  ;;  %v672_v63 = vadd.f32 %v654_v21, %v594_v60 }
 0x139   : > { %v484_v24 = vpop.f32.mrf.mxu1 }
 0x13a   : > { %v1747_v27 = vpop.f32.mrf.mxu0  ;;  %v485_v17 = vadd.f32 %v484_v24, %v1716_v3  ;;  %v758_v52 = vadd.f32 %v740_v20, %v672_v63 }
 0x13c   : > { %v595_v6 = vadd.f32 %v1745_v23, %v485_v17 }
 0x13f   : > { %v1749_v28 = vpop.f32.mrf.mxu3 }
 0x140   : > { %v1751_v31 = vpop.f32.mrf.mxu2  ;;  %v673_v42 = vadd.f32 %v1749_v28, %v595_v6 }
 0x141   : > { %v1753_v32 = vpop.f32.mrf.mxu1 }
 0x142   : > { %v1755_v33 = vpop.f32.mrf.mxu0  ;;  %v759_v20 = vadd.f32 %v1747_v27, %v673_v42 }
 0x147   : > { %v1757_v35 = vpop.f32.mrf.mxu3 }
 0x148   : > { %v1759_v38 = vpop.f32.mrf.mxu2 }
 0x149   : > { %v1761_v9 = vpop.f32.mrf.mxu1 }
 0x14a   : > { %v1763_v8 = vpop.f32.mrf.mxu0 }
 0x14f   : > { %v1765_v37 = vpop.f32.mrf.mxu3 }
 0x150   : > { %v1767_v10 = vpop.f32.mrf.mxu2 }
 0x151   : > { %v1769_v1 = vpop.f32.mrf.mxu1 }
 0x152   : > { %v1771_v26 = vpop.f32.mrf.mxu0 }
 0x157   : > { %v1773_v41 = vpop.f32.mrf.mxu3 }
 0x158   : > { %v890_v12 = vpop.f32.mrf.mxu2 }
 0x159   : > { %v833_v0 = vpop.f32.mrf.mxu1 }
 0x15a   : > { %v857_v43 = vadd.f32 %v833_v0, %v755_v36  ;;  %v1008_v4 = vpop.f32.mrf.mxu0 }
 0x15c   : > { %v914_v30 = vadd.f32 %v890_v12, %v857_v43  ;;  %v488_v43 = vadd.f32 %v1753_v32, %v1734_v51  ;;  %v491_v51 = vadd.f32 %v1761_v9, %v1732_v50  ;;  %v494_v50 = vadd.f32 %v1769_v1, %v1743_v22 }
 0x15e   : > { %v596_v23 = vadd.f32 %v1751_v31, %v488_v43  ;;  %v597_v31 = vadd.f32 %v1759_v38, %v491_v51  ;;  %v598_v38 = vadd.f32 %v1767_v10, %v494_v50 }
 0x15f   : > { %v948_v14 = vpop.f32.mrf.mxu3 }
 0x160   : > { %v972_v46 = vadd.f32 %v948_v14, %v914_v30  ;;  %v893_v47 = vpop.f32.mrf.mxu2  ;;  %v674_v28 = vadd.f32 %v1757_v35, %v596_v23  ;;  %v675_v35 = vadd.f32 %v1765_v37, %v597_v31 }
 0x161   : > { %v836_v5 = vpop.f32.mrf.mxu1 }
 0x162   : > { %v858_v29 = vadd.f32 %v836_v5, %v756_v45  ;;  %v1032_v49 = vadd.f32 %v1008_v4, %v972_v46  ;;  %v1011_v53 = vpop.f32.mrf.mxu0  ;;  %v760_v27 = vadd.f32 %v1755_v33, %v674_v28  ;;  %v761_v33 = vadd.f32 %v1763_v8, %v675_v35 }
 0x164   : > { %v1044_v16 = vadd.f32 %v1779_v48, %v1032_v49  ;;  %v915_v54 = vadd.f32 %v893_v47, %v858_v29 }
 0x166   : > { %1052 = vxpose.xlu2.b32.start [1/8] (short) (narrow) %v1044_v16, 8 }
 0x167   : > { %v951_v55 = vpop.f32.mrf.mxu3 }
 0x168   : > { %v973_v57 = vadd.f32 %v951_v55, %v915_v54  ;;  %v896_v58 = vpop.f32.mrf.mxu2 }
 0x169   : > { %v839_v59 = vpop.f32.mrf.mxu1 }
 0x16a   : > { %v859_v61 = vadd.f32 %v839_v59, %v757_v56  ;;  %v1033_v62 = vadd.f32 %v1011_v53, %v973_v57  ;;  %v1014_v2 = vpop.f32.mrf.mxu0  ;;  %v676_v59 = vadd.f32 %v1773_v41, %v598_v38 }
 0x16c   : > { %v1045_v39 = vadd.f32 %v1779_v48, %v1033_v62  ;;  %v916_v40 = vadd.f32 %v896_v58, %v859_v61  ;;  %v762_v1 = vadd.f32 %v1771_v26, %v676_v59 }
 0x16e   : > { %1053 = vxpose.xlu2.b32.cont [2/8] (short) (narrow) %v1045_v39, 8 }
 0x16f   : > { %v954_v11 = vpop.f32.mrf.mxu3 }
 0x170   : > { %v974_v19 = vadd.f32 %v954_v11, %v916_v40  ;;  %v899_v7 = vpop.f32.mrf.mxu2 }
 0x171   : > { %v842_v36 = vpop.f32.mrf.mxu1 }
 0x172   : > { %v860_v12 = vadd.f32 %v842_v36, %v758_v52  ;;  %v1034_v0 = vadd.f32 %v1014_v2, %v974_v19  ;;  %v1017_v18 = vpop.f32.mrf.mxu0 }
 0x174   : > { %v1046_v21 = vadd.f32 %v1779_v48, %v1034_v0  ;;  %v917_v3 = vadd.f32 %v899_v7, %v860_v12 }
 0x176   : > { %1054 = vxpose.xlu2.b32.cont [3/8] (short) (narrow) %v1046_v21, 8 }
 0x177   : > { %v957_v24 = vpop.f32.mrf.mxu3 }
 0x178   : > { %v975_v4 = vadd.f32 %v957_v24, %v917_v3  ;;  %v902_v13 = vpop.f32.mrf.mxu2 }
 0x179   : > { %v845_v25 = vpop.f32.mrf.mxu1 }
 0x17a   : > { %v861_v30 = vadd.f32 %v845_v25, %v759_v20  ;;  %v1035_v14 = vadd.f32 %v1017_v18, %v975_v4  ;;  %v1020_v45 = vpop.f32.mrf.mxu0 }
 0x17c   : > { %v1047_v46 = vadd.f32 %v1779_v48, %v1035_v14  ;;  %v918_v32 = vadd.f32 %v902_v13, %v861_v30 }
 0x17e   : > { %1055 = vxpose.xlu2.b32.cont [4/8] (short) (narrow) %v1047_v46, 8 }
 0x17f   : > { %v960_v47 = vpop.f32.mrf.mxu3 }
 0x180   : > { %v976_v5 = vadd.f32 %v960_v47, %v918_v32  ;;  %v905_v15 = vpop.f32.mrf.mxu2 }
 0x181   : > { %v848_v29 = vpop.f32.mrf.mxu1 }
 0x182   : > { %v862_v49 = vadd.f32 %v848_v29, %v760_v27  ;;  %v1036_v53 = vadd.f32 %v1020_v45, %v976_v5  ;;  %v1023_v34 = vpop.f32.mrf.mxu0 }
 0x184   : > { %v1048_v16 = vadd.f32 %v1779_v48, %v1036_v53  ;;  %v919_v9 = vadd.f32 %v905_v15, %v862_v49 }
 0x186   : > { %1056 = vxpose.xlu2.b32.cont [5/8] (short) (narrow) %v1048_v16, 8 }
 0x187   : > { %v963_v44 = vpop.f32.mrf.mxu3 }
 0x188   : > { %v977_v54 = vadd.f32 %v963_v44, %v919_v9  ;;  %v908_v56 = vpop.f32.mrf.mxu2 }
 0x189   : > { %v851_v55 = vpop.f32.mrf.mxu1 }
 0x18a   : > { %v863_v57 = vadd.f32 %v851_v55, %v761_v33  ;;  %v1037_v58 = vadd.f32 %v1023_v34, %v977_v54  ;;  %v1026_v60 = vpop.f32.mrf.mxu0 }
 0x18c   : > { %v1049_v37 = vadd.f32 %v1779_v48, %v1037_v58  ;;  %v920_v61 = vadd.f32 %v908_v56, %v863_v57 }
 0x18e   : > { %1057 = vxpose.xlu2.b32.cont [6/8] (short) (narrow) %v1049_v37, 8 }
 0x18f   : > { %v966_v22 = vpop.f32.mrf.mxu3 }
 0x190   : > { %v978_v62 = vadd.f32 %v966_v22, %v920_v61  ;;  %v911_v39 = vpop.f32.mrf.mxu2 }
 0x191   : > { %v854_v8 = vpop.f32.mrf.mxu1 }
 0x192   : > { %v864_v2 = vadd.f32 %v854_v8, %v762_v1  ;;  %v1038_v63 = vadd.f32 %v1026_v60, %v978_v62  ;;  %v1029_v41 = vpop.f32.mrf.mxu0 }
 0x194   : > { %v1050_v10 = vadd.f32 %v1779_v48, %v1038_v63  ;;  %v921_v17 = vadd.f32 %v911_v39, %v864_v2 }
 0x196   : > { %1058 = vxpose.xlu2.b32.cont [7/8] (short) (narrow) %v1050_v10, 8 }
 0x197   : > { %v969_v40 = vpop.f32.mrf.mxu3 }
 0x198   : > { %v979_v11 = vadd.f32 %v969_v40, %v921_v17 }
 0x19a   : > { %v1039_v52 = vadd.f32 %v1029_v41, %v979_v11 }
 0x19c   : > { %v1051_v19 = vadd.f32 %v1779_v48, %v1039_v52 }
 0x19e   : > { %1059 = vxpose.xlu2.b32.end [8/8] (short) (narrow) %v1051_v19, 8 }
 0x1ff   : > { %v1068_v26 = vpop.trf.xlu2 }
 0x200   : > { %1085 = vst.msk [vmem:[%s312_s29] sm:$0xf] %vm1084_vm3, %v1068_v26 }
 0x201 PF: > { %s14_s17 = sadd.s32 1, %s1343_s17   ;;  %s1827_s15 = smov %s1339_s16 }
 0x202   : > { %p11_p5 = scmp.ge.s32.totalorder %s14_s17, 4   ;;  %s1828_s16 = smov %s1830_s18 }
 0x204   :  { %13 = sbr.rel (!%p11_p5) target bundleno = 2 (0x2), region = 77 }

</bundles_post_ra>
